<compile_context>
chip_gen: v7x
topology: tpu7x:2x2x1
jax: 0.10.0
libtpu: 0.0.40
codegen_flags: <defaults>
</compile_context>

<pallas_src>
import functools

import jax
import jax.numpy as jnp
from jax import lax
from jax.experimental import pallas as pl
from jax.experimental.pallas import tpu as pltpu

LANE = 128
SUBLANE = 8
_SMALL_INPUT_BYTES = 1 << 20  # below this, skip the kernel entirely


def _device_kind():
    try:
        return jax.devices()[0].device_kind.lower()
    except Exception:  # pragma: no cover - defensive
        return ""


def _target_block_bytes(kind):
    # Per-input block bytes: big enough to amortize the ~0.35us/grid-step
    # overhead, small enough that 2 inputs x 2 pipeline buffers fit the
    # scoped VMEM budget of every generation.
    if "v5 lite" in kind or "v5e" in kind or "v5lite" in kind:
        return 2 * 1024 * 1024  # v5e: 16 MiB default scoped VMEM -> 8 MiB resident
    return 4 * 1024 * 1024      # v6e / v7x / others: 16 MiB resident


def _num_tensorcores(kind):
    # Chips exposing 2 TensorCores behind one device (megacore): v4, v5p, v7x.
    # Misdetection only costs a negligible amount of perf, never correctness.
    if any(tag in kind for tag in ("v7", "v4", "v5p")):
        return 2
    return 1


def _mae_sum_kernel(yhat_ref, y_ref, out_ref, acc_ref, *, rows, block_rows,
                    steps_per_core, total_steps, need_mask):
    c = pl.program_id(0)          # core / row-range split
    i = pl.program_id(1)          # step within this core's row range
    gs = c * steps_per_core + i   # global step along the row axis

    @pl.when(i == 0)
    def _():
        acc_ref[...] = jnp.zeros_like(acc_ref)

    # Upcast in-kernel so sub-f32 inputs (e.g. bf16) stream HBM at native width.
    absd = jnp.abs(yhat_ref[...].astype(jnp.float32)
                   - y_ref[...].astype(jnp.float32))

    def _accum(vals):
        # (block_rows,128) -> (block_rows/8, 8, 128) summed over the leading
        # axis: pure VPU vreg adds each step, no per-step cross-lane work.
        acc_ref[...] += jnp.sum(vals.reshape(-1, SUBLANE, LANE), axis=0)

    if need_mask:
        last = total_steps - 1

        @pl.when(gs < last)
        def _():
            _accum(absd)

        # Last real step (and redundant, index-clamped steps past it on the
        # other core): zero rows beyond the real extent before accumulating.
        # Garbage (possibly NaN) values never leave the jnp.where select.
        @pl.when(gs >= last)
        def _():
            row_ids = gs * block_rows + lax.broadcasted_iota(
                jnp.int32, (block_rows, LANE), 0)
            _accum(jnp.where(row_ids < rows, absd, 0.0))
    else:
        _accum(absd)

    @pl.when(i == steps_per_core - 1)
    def _():
        # One cross-lane/sublane reduction per core, exactly once.
        out_ref[0, 0] = jnp.sum(acc_ref[...])


def mae_loss(yhat, y, *, force_kernel=False, block_rows=None):
    """Pallas equivalent of torch.mean(torch.abs(yhat - y)) -> scalar f32."""
    assert yhat.shape == y.shape, "yhat / y shape mismatch"
    n_real = int(yhat.size)
    if n_real == 0:
        return jnp.float32(jnp.nan)  # matches torch.mean of an empty tensor

    itemsize = max(jnp.dtype(yhat.dtype).itemsize, jnp.dtype(y.dtype).itemsize)
    total_in_bytes = n_real * (jnp.dtype(yhat.dtype).itemsize
                               + jnp.dtype(y.dtype).itemsize)

    def _jnp_fallback():
        return jnp.mean(jnp.abs(yhat.astype(jnp.float32)
                                - y.astype(jnp.float32)))

    # Small-input fast path: kernel launch + pipeline startup costs more than
    # a fused XLA reduction for tiny tensors.
    if not force_kernel and total_in_bytes < _SMALL_INPUT_BYTES:
        return _jnp_fallback()

    yhat_flat = jnp.ravel(yhat)
    y_flat = jnp.ravel(y)

    tile_elems = SUBLANE * LANE                       # 1024
    n_aligned = (n_real // tile_elems) * tile_elems   # kernel prefix
    if n_aligned == 0:
        return _jnp_fallback()

    rows = n_aligned // LANE                          # multiple of 8
    yhat_2d = yhat_flat[:n_aligned].reshape(rows, LANE)
    y_2d = y_flat[:n_aligned].reshape(rows, LANE)

    kind = _device_kind()
    if block_rows is None:
        target_bytes = _target_block_bytes(kind)
        # Byte-constant blocks across dtypes; multiple of 32 rows covers
        # f32/bf16/int8 sublane packing.
        block_rows = max(32, (target_bytes // (LANE * itemsize)) // 32 * 32)
    else:
        block_rows = max(SUBLANE, (int(block_rows) // SUBLANE) * SUBLANE)
    block_rows = min(block_rows, rows)                # full-extent also legal

    total_steps = pl.cdiv(rows, block_rows)
    num_cores = max(1, min(_num_tensorcores(kind), total_steps))
    steps_per_core = pl.cdiv(total_steps, num_cores)
    need_mask = (rows % block_rows != 0) or (steps_per_core * num_cores
                                             != total_steps)

    def in_index(c, i):
        gs = c * steps_per_core + i
        # Redundant steps past the real extent re-read the last block; their
        # contribution is zeroed in-kernel by the row mask.
        return (jnp.minimum(gs, total_steps - 1), 0)

    resident = 2 * 2 * block_rows * LANE * itemsize   # 2 inputs x 2 buffers
    vmem_limit = int(min(48 * 1024 * 1024,
                         max(32 * 1024 * 1024, resident + 8 * 1024 * 1024)))

    cost = pl.CostEstimate(
        flops=2 * n_aligned, transcendentals=0,
        bytes_accessed=n_aligned * (jnp.dtype(yhat.dtype).itemsize
                                    + jnp.dtype(y.dtype).itemsize)
        + num_cores * 4)

    partials = pl.pallas_call(
        functools.partial(_mae_sum_kernel, rows=rows, block_rows=block_rows,
                          steps_per_core=steps_per_core,
                          total_steps=total_steps, need_mask=need_mask),
        out_shape=jax.ShapeDtypeStruct((num_cores, 1), jnp.float32),
        grid_spec=pltpu.PrefetchScalarGridSpec(
            num_scalar_prefetch=0,
            grid=(num_cores, steps_per_core),
            in_specs=[
                pl.BlockSpec((block_rows, LANE), in_index),
                pl.BlockSpec((block_rows, LANE), in_index),
            ],
            out_specs=pl.BlockSpec((1, 1), lambda c, i: (c, 0),
                                   memory_space=pltpu.SMEM),
            scratch_shapes=[pltpu.VMEM((SUBLANE, LANE), jnp.float32)],
        ),
        compiler_params=pltpu.CompilerParams(
            dimension_semantics=("parallel", "arbitrary"),
            vmem_limit_bytes=vmem_limit,
        ),
        cost_estimate=cost,
    )(yhat_2d, y_2d)

    total = jnp.sum(partials)

    # <=1023-element unaligned tail: tiny fused XLA sum, no HBM pad copy.
    if n_aligned != n_real:
        total = total + jnp.sum(jnp.abs(
            yhat_flat[n_aligned:].astype(jnp.float32)
            - y_flat[n_aligned:].astype(jnp.float32)))

    return total / jnp.float32(n_real)


if __name__ == "__main__":
    key = jax.random.PRNGKey(0)
    k1, k2, k3, k4, k5, k6, k7, k8 = jax.random.split(key, 8)

    # 1) Tiny prediction/target pair (batch=2, seq=8, feat=16): fast path.
    yhat = jax.random.normal(k1, (2, 8, 16), dtype=jnp.float32)
    y = jax.random.normal(k2, (2, 8, 16), dtype=jnp.float32)
    loss = jax.block_until_ready(mae_loss(yhat, y))
    ref = jnp.mean(jnp.abs(yhat - y))
    assert jnp.allclose(loss, ref, rtol=1e-6, atol=1e-6), (loss, ref)

    # 2) Aligned shape forced through the kernel, small block_rows to exercise
    #    the multi-step unmasked accumulation (and the 2-core split if present).
    yhat2 = jax.random.normal(k3, (4, 64, 128), dtype=jnp.float32)
    y2 = jax.random.normal(k4, (4, 64, 128), dtype=jnp.float32)
    loss2 = jax.block_until_ready(mae_loss(yhat2, y2, force_kernel=True,
                                           block_rows=64))
    ref2 = jnp.mean(jnp.abs(yhat2 - y2))
    assert jnp.allclose(loss2, ref2, rtol=1e-6, atol=1e-6), (loss2, ref2)

    # 3) Misaligned shape: aligned-prefix kernel (ragged last block mask)
    #    + wrapper-side tail sum, multi-step grid.
    yhat3 = jax.random.normal(k5, (5, 300, 257), dtype=jnp.float32)
    y3 = jax.random.normal(k6, (5, 300, 257), dtype=jnp.float32)
    loss3 = jax.block_until_ready(mae_loss(yhat3, y3, force_kernel=True,
                                           block_rows=512))
    ref3 = jnp.mean(jnp.abs(yhat3 - y3))
    assert jnp.allclose(loss3, ref3, rtol=1e-5, atol=1e-6), (loss3, ref3)

    # 4) bf16 inputs: in-kernel upcast + dtype-scaled block sizing.
    yhat4 = jax.random.normal(k7, (4, 64, 128), dtype=jnp.bfloat16)
    y4 = jax.random.normal(k8, (4, 64, 128), dtype=jnp.bfloat16)
    loss4 = jax.block_until_ready(mae_loss(yhat4, y4, force_kernel=True))
    ref4 = jnp.mean(jnp.abs(yhat4.astype(jnp.float32)
                            - y4.astype(jnp.float32)))
    assert jnp.allclose(loss4, ref4, rtol=1e-5, atol=1e-6), (loss4, ref4)

    print("KERNEL_OK")
</pallas_src>

<mosaic_0001>
module attributes {stable_mosaic.version = 11 : i64} {
  func.func @_mae_sum_kernel(%arg0: i32, %arg1: i32, %arg2: memref<64x128xf32, #tpu.memory_space<vmem>>, %arg3: memref<64x128xf32, #tpu.memory_space<vmem>>, %arg4: memref<1x1xf32, #tpu.memory_space<smem>>, %arg5: memref<8x128xf32, #tpu.memory_space<vmem>>) attributes {dimension_semantics = [#tpu.dimension_semantics<parallel>, #tpu.dimension_semantics<arbitrary>], iteration_bounds = array<i64: 1, 4>, scalar_prefetch = 0 : i64, scratch_operands = 1 : i64, tpu.core_type = #tpu.core_type<tc>, window_params = [{transform_indices = @transform_0, window_bounds = array<i64: 64, 128>}, {transform_indices = @transform_1, window_bounds = array<i64: 64, 128>}, {transform_indices = @transform_2, window_bounds = array<i64: 1, 1>}]} {
    %c0_i32 = arith.constant 0 : i32
    %0 = arith.cmpi eq, %arg1, %c0_i32 : i32
    %1 = arith.extui %0 : i1 to i32
    %c0_i32_0 = arith.constant 0 : i32
    %2 = arith.cmpi ne, %1, %c0_i32_0 : i32
    scf.if %2 {
      %cst_9 = arith.constant 0.000000e+00 : f32
      %15 = vector.broadcast %cst_9 : f32 to vector<8x128xf32>
      %c0_10 = arith.constant 0 : index
      %c0_11 = arith.constant 0 : index
      %16 = vector.load %arg5[%c0_10, %c0_11] : memref<8x128xf32, #tpu.memory_space<vmem>>, vector<8x128xf32>
      tpu.vector_store %arg5[%c0_10, %c0_11], %15 {strides = array<i32>} : memref<8x128xf32, #tpu.memory_space<vmem>>, vector<8x128xf32>,
    } else {
    }
    %c0 = arith.constant 0 : index
    %c0_1 = arith.constant 0 : index
    %3 = vector.load %arg2[%c0, %c0_1] : memref<64x128xf32, #tpu.memory_space<vmem>>, vector<64x128xf32>
    %c0_2 = arith.constant 0 : index
    %c0_3 = arith.constant 0 : index
    %4 = vector.load %arg3[%c0_2, %c0_3] : memref<64x128xf32, #tpu.memory_space<vmem>>, vector<64x128xf32>
    %5 = arith.subf %3, %4 : vector<64x128xf32>
    %6 = math.absf %5 : vector<64x128xf32>
    %c0_4 = arith.constant 0 : index
    %c0_5 = arith.constant 0 : index
    %7 = vector.load %arg5[%c0_4, %c0_5] : memref<8x128xf32, #tpu.memory_space<vmem>>, vector<8x128xf32>
    %8 = vector.shape_cast %6 : vector<64x128xf32> to vector<8x8x128xf32>
    %cst = arith.constant dense<0.000000e+00> : vector<8x128xf32>
    %9 = vector.multi_reduction <add>, %8, %cst [0] : vector<8x8x128xf32> to vector<8x128xf32>
    %10 = arith.addf %7, %9 : vector<8x128xf32>
    %c0_6 = arith.constant 0 : index
    %c0_7 = arith.constant 0 : index
    %11 = vector.load %arg5[%c0_6, %c0_7] : memref<8x128xf32, #tpu.memory_space<vmem>>, vector<8x128xf32>
    tpu.vector_store %arg5[%c0_6, %c0_7], %10 {strides = array<i32>} : memref<8x128xf32, #tpu.memory_space<vmem>>, vector<8x128xf32>,
    %c3_i32 = arith.constant 3 : i32
    %12 = arith.cmpi eq, %arg1, %c3_i32 : i32
    %13 = arith.extui %12 : i1 to i32
    %c0_i32_8 = arith.constant 0 : i32
    %14 = arith.cmpi ne, %13, %c0_i32_8 : i32
    scf.if %14 {
      %c0_9 = arith.constant 0 : index
      %c0_10 = arith.constant 0 : index
      %15 = vector.load %arg5[%c0_9, %c0_10] : memref<8x128xf32, #tpu.memory_space<vmem>>, vector<8x128xf32>
      %16 = vector.shape_cast %15 : vector<8x128xf32> to vector<1x8x128xf32>
      %cst_11 = arith.constant dense<0.000000e+00> : vector<1xf32>
      %17 = vector.multi_reduction <add>, %16, %cst_11 [1, 2] : vector<1x8x128xf32> to vector<1xf32>
      %18 = vector.shape_cast %17 : vector<1xf32> to vector<1x1x1xf32>
      %19 = vector.extract %18[0, 0, 0] : f32 from vector<1x1x1xf32>
      %c0_12 = arith.constant 0 : index
      %c0_13 = arith.constant 0 : index
      %20 = memref.load %arg4[%c0_12, %c0_13] : memref<1x1xf32, #tpu.memory_space<smem>>
      memref.store %19, %arg4[%c0_12, %c0_13] : memref<1x1xf32, #tpu.memory_space<smem>>
    } else {
    }
    return
  }
  func.func @transform_0(%arg0: i32, %arg1: i32) -> (i32, i32) {
    %c4_i32 = arith.constant 4 : i32
    %0 = arith.muli %arg0, %c4_i32 : i32
    %1 = arith.addi %0, %arg1 : i32
    %c3_i32 = arith.constant 3 : i32
    %2 = arith.minsi %1, %c3_i32 : i32
    %c0_i32 = arith.constant 0 : i32
    %c0_i32_0 = arith.constant 0 : i32
    return %2, %c0_i32 : i32, i32
  }
  func.func @transform_1(%arg0: i32, %arg1: i32) -> (i32, i32) {
    %c4_i32 = arith.constant 4 : i32
    %0 = arith.muli %arg0, %c4_i32 : i32
    %1 = arith.addi %0, %arg1 : i32
    %c3_i32 = arith.constant 3 : i32
    %2 = arith.minsi %1, %c3_i32 : i32
    %c0_i32 = arith.constant 0 : i32
    %c0_i32_0 = arith.constant 0 : i32
    return %2, %c0_i32 : i32, i32
  }
  func.func @transform_2(%arg0: i32, %arg1: i32) -> (i32, i32) {
    %c0_i32 = arith.constant 0 : i32
    %c0_i32_0 = arith.constant 0 : i32
    return %arg0, %c0_i32 : i32, i32
  }
}

</mosaic_0001>

<bundles_post_ra>
// kernel: tpu_custom_call.1
= control target key start
LH: loop header
LB: loop body
LE: loop exit
PB: predicated region body
PF: predicated region fallthrough
CT: control target
= control target key end

     0   :  { %7 = vsyncpa [#allocation4], 0  ;;  %s857_s0 = inlined_call_operand.hbm [shape: f32[256,128], index: 0, kind: input, shape index: {}]   ;;  %s858_s1 = inlined_call_operand.hbm [shape: f32[256,128], index: 1, kind: input, shape index: {}]   ;;  %s859_s2 = inlined_call_operand.hbm [shape: f32[1,1], index: 2, kind: output, shape index: {}]  }
   0x1   :  { %9 = vsyncpa [#allocation4 + $0x1], 0 }
   0x2   :  { %10 = vsyncpa [#allocation7], 0 }
   0x3   :  { %12 = vsyncpa [#allocation7 + $0x1], 0 }
   0x4   :  { %13 = vsyncpa [#allocation5], 0  ;;  %s641_s9 = smov 0   ;;  %s643_s10 = smov 0  }
   0x5   :  { %s645_s11 = smov 0   ;;  %s647_s12 = smov 0  }
   0x6   :  { %s649_s13 = smov 0   ;;  %s651_s14 = smov 0  }
   0x7 LB: > { %s396_s15 = sadd.s32 4294967295, %s618_s14   ;;  %s28_s16 = sadd.s32 1, %s614_s13  ;;  %s618_s14 = sphi %s651_s14, %s19_s14   ;;  %s614_s13 = sphi %s649_s13, %s869_s13   ;;  %s610_s12 = sphi %s647_s12, %s868_s12   ;;  %s606_s11 = sphi %s645_s11, %s867_s11   ;;  %s602_s10 = sphi %s643_s10, %s866_s10   ;;  %s598_s9 = sphi %s641_s9, %s865_s9  }
   0x8   : > { %p29_p0 = scmp.ge.s32.totalorder %s28_s16, 4  ;;  %p37_p1 = scmp.lt.s32.totalorder %s614_s13, 3 }
   0x9   : > { %s46_s17 = sadd.s32 1, %s606_s11  ;;  %p53_p2 = scmp.ne.s32.totalorder %s606_s11, %s602_s10 }
   0xa   : > { %s871_s16 = smov (%p29_p0, %s28_s16), 0  ;;  %p54_p4 = scmp.eq.s32.totalorder %s618_s14, 0 }
   0xb   : > { %s678_s18 = scalar_select %p37_p1, %s614_s13, 3 }
   0xc   : > { %p41_p3 = scmp.lt.s32.totalorder %s871_s16, 3  ;;  %p59_p5 = scmp.ne.s32.totalorder %s602_s10, %s598_s9 }
   0xd   : > { %p60_p6 = scmp.eq.s32.totalorder %s396_s15, 0  ;;  %p55_p7 = por %p54_p4, %p53_p2 }
   0xe   : > { %s42_s19 = scalar_select %p41_p3, %s871_s16, 3 }
   0xf   : > { %p686_p8 = por %p60_p6, %p59_p5  ;;  %p433_p10 = scmp.lt.s32.totalorder %s618_s14, 4 }
  0x10   : > { %s43_s21 = ssub.s32 %s678_s18, %s42_s19  ;;  %s693_s22 = sand.u32 1, %s606_s11  }
  0x11   : > { %s861_s20 = scalar_select %p686_p8, 1, 0 }
  0x12   : > { %p44_p9 = scmp.eq.s32.totalorder %s43_s21, 0  ;;  %s414_s23 = sshll.u32 %s678_s18, 10 }
  0x13   : > { %s399_s25 = sshll.u32 %s693_s22, 6  ;;  %s705_s28 = scalar_lea.hbm %s857_s0, %s414_s23 }
  0x14   : > { %s697_s24 = scalar_select %p44_p9, %s606_s11, %s46_s17  }
  0x15   : > { %s147_s29 = scalar_lea.vmem [#allocation3], %s399_s25  ;;  %p709_p11 = pnand %p433_p10, %p55_p7 }
  0x16   : > { %s158_s30 = sshll.u32 %s147_s29, 4  ;;  %s144_s4 = scalar_lea.sflag [#allocation4], %s693_s22  ;;  %s713_s30 = int_to_ptr.vmem [resolvable:$true] %s158_s30 }
  0x17   : > { %s488_s5 = scalar_lea.hbm %s705_s28, 1024  ;;  %p490_p13 = pneg %p709_p11 }
  0x18   : > { %p489_p12 = scmp.ne.s32.totalorder %s705_s28, %s488_s5  ;;  %s493_s8 = scalar_lea.hbm %s857_s0, 4096 }
  0x19   : > { %p494_p2 = scmp.lt.u32.totalorder %s705_s28, %s857_s0  ;;  %p495_p3 = scmp.lt.u32.totalorder %s493_s8, %s488_s5 }
  0x1a   : > { %p491_p0 = pnand %p490_p13, %p489_p12  ;;  %p497_p5 = scmp.lt.u32.totalorder %s488_s5, %s705_s28 }
  0x1b   : > { %p496_p4 = por %p495_p3, %p494_p2 }
  0x1c   : > { %p492_p1 = pneg %p491_p0 }
  0x1d   : > { %p498_p6 = por %p497_p5, %p496_p4 }
  0x1f   : > { %p499_p7 = pnand %p498_p6, %p492_p1 }
  0x21   : > { %502 = shalt.err (!%p499_p7)
}
  0x22   : > { %s503_s19 = scalar_lea.vmem %s713_s30, 1024  ;;  %s620_s21 = smov [#allocation3]  }
  0x23   : > { %p504_p9 = scmp.ne.s32.totalorder %s713_s30, %s503_s19  ;;  %s508_s26 = sshll.u32 %s620_s21, 4  ;;  %s509_s26 = int_to_ptr.vmem [resolvable:$false] %s508_s26 }
  0x24   : > { %s510_s27 = scalar_lea.vmem %s509_s26, 2048  ;;  %p511_p0 = scmp.lt.s32.totalorder %s713_s30, %s509_s26 }
  0x25   : > { %p506_p10 = pnand %p504_p9, %p490_p13  ;;  %p512_p2 = scmp.lt.s32.totalorder %s510_s27, %s503_s19 }
  0x27   : > { %p507_p12 = pneg %p506_p10  ;;  %p513_p3 = por %p512_p2, %p511_p0 }
  0x29   : > { %p514_p4 = pnand %p513_p3, %p507_p12 }
  0x2b   : > { %517 = shalt.err (!%p514_p4)
}
  0x2c   : > { %s621_s29 = smov 128   ;;  %s622_s5 = smov 8  }
  0x2d   : > { %429 = dma.hbm_to_vmem [thread:$0]  (!%p709_p11), %s705_s28, 1024, %s713_s30, %s144_s4, %s621_s29, %s621_s29, %s622_s5  }
  0x2e   : > { %p405_p1 = scmp.ge.s32.totalorder %s618_s14, 1  ;;  %p191_p5 = scmp.lt.s32.totalorder %s618_s14, 5 }
  0x2f   : > { %s757_s9 = scalar_lea.hbm %s858_s1, %s414_s23  ;;  %s172_s17 = scalar_lea.vmem [#allocation6], %s399_s25 }
  0x30   : > { %p748_p6 = pnand %p405_p1, %p191_p5  ;;  %s183_s19 = sshll.u32 %s172_s17, 4  ;;  %s761_s19 = int_to_ptr.vmem [resolvable:$true] %s183_s19 }
  0x31   : > { %s169_s28 = scalar_lea.sflag [#allocation7], %s693_s22  ;;  %s518_s30 = scalar_lea.hbm %s757_s9, 1024 }
  0x32   : > { %p519_p7 = scmp.ne.s32.totalorder %s757_s9, %s518_s30  ;;  %s523_s23 = scalar_lea.hbm %s858_s1, 4096 }
  0x33   : > { %p524_p12 = scmp.lt.u32.totalorder %s757_s9, %s858_s1  ;;  %p525_p0 = scmp.lt.u32.totalorder %s523_s23, %s518_s30 }
  0x34   : > { %p521_p9 = pnand %p519_p7, %p490_p13  ;;  %p527_p3 = scmp.lt.u32.totalorder %s518_s30, %s757_s9 }
  0x35   : > { %p526_p2 = por %p525_p0, %p524_p12 }
  0x36   : > { %p522_p10 = pneg %p521_p9 }
  0x37   : > { %p528_p4 = por %p527_p3, %p526_p2 }
  0x39   : > { %p529_p1 = pnand %p528_p4, %p522_p10 }
  0x3b   : > { %532 = shalt.err (!%p529_p1)
}
  0x3c   : > { %s533_s25 = scalar_lea.vmem %s761_s19, 1024  ;;  %s623_s27 = smov [#allocation6]  }
  0x3d   : > { %p534_p5 = scmp.ne.s32.totalorder %s761_s19, %s533_s25  ;;  %s538_s7 = sshll.u32 %s623_s27, 4  ;;  %s539_s7 = int_to_ptr.vmem [resolvable:$false] %s538_s7 }
  0x3e   : > { %s540_s8 = scalar_lea.vmem %s539_s7, 2048  ;;  %p541_p8 = scmp.lt.s32.totalorder %s761_s19, %s539_s7 }
  0x3f   : > { %p536_p7 = pnand %p534_p5, %p490_p13  ;;  %p542_p12 = scmp.lt.s32.totalorder %s540_s8, %s533_s25 }
  0x41   : > { %p537_p9 = pneg %p536_p7  ;;  %p543_p0 = por %p542_p12, %p541_p8 }
  0x43   : > { %p544_p2 = pnand %p543_p0, %p537_p9 }
  0x45   : > { %547 = shalt.err (!%p544_p2)
}
  0x46   : > { %432 = dma.hbm_to_vmem [thread:$0]  (!%p709_p11), %s757_s9, 1024, %s761_s19, %s169_s28, %s621_s29, %s621_s29, %s622_s5  }
  0x47   : > { %195 = sbr.rel (%p748_p6) target bundleno = 341 (0x155), region = 28  ;;  %s197_s17 = sand.u32 (!%p748_p6), 1, %s602_s10  }
  0x48   : > { %s406_s30 = sshll.u32 (!%p748_p6), %s197_s17, 6  ;;  %s198_s18 = scalar_lea.sflag (!%p748_p6), [#allocation4], %s197_s17 }
  0x49   : > { %s795_s4 = scalar_lea.vmem (!%p748_p6), [#allocation3], %s406_s30  ;;  %p864_p8 = scmp.ne.s32.totalorder (!%p748_p6), %s861_s20, 0 }
  0x4e   : > { %585 = dma.done.wait (%p864_p8), %s198_s18, 1024  }
  0x4f   : > { %587 = vsyncadd (%p864_p8), %s198_s18, 4294966272  ;;  %s207_s22 = scalar_lea.sflag [#allocation7], %s197_s17  ;;  %s801_s3 = scalar_lea.vmem [#allocation6], %s406_s30 }
  0x50   : > { %589 = dma.done.wait (%p864_p8), %s207_s22, 1024  }
  0x51   : > { %591 = vsyncadd (%p864_p8), %s207_s22, 4294966272  ;;  %p408_p11 = scmp.ne.s32.totalorder %s610_s12, 0 }
  0x52   : > { %v624_v0 = vmov (!%p408_p11), 0.0  }
  0x53   : > { %244 = sbr.rel (%p408_p11) target bundleno = 90 (0x5a), region = 40  ;;  %245 = vst [vmem:[#allocation2] sm:$0xff] (!%p408_p11), %v624_v0 }
  0x5a PF: > { %v246_v1 = vld [vmem:[%s795_s4] sm:$0xff]  ;;  %v247_v2 = vld [vmem:[%s795_s4 + $0x8] sm:$0xff]  ;;  %v248_v3 = vld [vmem:[%s795_s4 + $0x10] sm:$0xff]  ;;  %p409_p13 = scmp.ne.s32.totalorder %s610_s12, 3 }
  0x5b   : > { %v249_v4 = vld [vmem:[%s795_s4 + $0x18] sm:$0xff]  ;;  %v250_v5 = vld [vmem:[%s795_s4 + $0x20] sm:$0xff]  ;;  %v255_v7 = vld [vmem:[%s801_s3 + $0x8] sm:$0xff] }
  0x5c   : > { %v254_v6 = vld [vmem:[%s801_s3] sm:$0xff]  ;;  %v256_v8 = vld [vmem:[%s801_s3 + $0x10] sm:$0xff]  ;;  %v257_v9 = vld [vmem:[%s801_s3 + $0x18] sm:$0xff]  ;;  %v263_v12 = vsub.f32 %v247_v2, %v255_v7 }
  0x5d   : > { %v262_v10 = vsub.f32 %v246_v1, %v254_v6  ;;  %v258_v11 = vld [vmem:[%s801_s3 + $0x20] sm:$0xff]  ;;  %v264_v13 = vsub.f32 %v248_v3, %v256_v8  ;;  %v265_v14 = vsub.f32 %v249_v4, %v257_v9  ;;  %v251_v15 = vld [vmem:[%s795_s4 + $0x28] sm:$0xff]  ;;  %v252_v21 = vld [vmem:[%s795_s4 + $0x30] sm:$0xff] }
  0x5e   : > { %v259_v16 = vld [vmem:[%s801_s3 + $0x28] sm:$0xff]  ;;  %v266_v18 = vsub.f32 %v250_v5, %v258_v11  ;;  %v271_v19 = vand.u32 2147483647, %v263_v12  ;;  %v260_v22 = vld [vmem:[%s801_s3 + $0x30] sm:$0xff]  ;;  %v253_v26 = vld [vmem:[%s795_s4 + $0x38] sm:$0xff] }
  0x5f   : > { %v270_v17 = vand.u32 2147483647, %v262_v10  ;;  %v272_v20 = vand.u32 2147483647, %v264_v13  ;;  %v267_v23 = vsub.f32 %v251_v15, %v259_v16  ;;  %v273_v24 = vand.u32 2147483647, %v265_v14 }
  0x60   : > { %v261_v27 = vld [vmem:[%s801_s3 + $0x38] sm:$0xff]  ;;  %v268_v28 = vsub.f32 %v252_v21, %v260_v22  ;;  %v274_v29 = vand.u32 2147483647, %v266_v18 }
  0x61   : > { %v279_v25 = vadd.f32 %v271_v19, %v270_v17  ;;  %v269_v31 = vsub.f32 %v253_v26, %v261_v27  ;;  %v275_v32 = vand.u32 2147483647, %v267_v23  ;;  %v278_v39 = vld [vmem:[#allocation2] sm:$0xff] }
  0x62   : > { %v276_v34 = vand.u32 2147483647, %v268_v28 }
  0x63   : > { %v280_v30 = vadd.f32 %v279_v25, %v272_v20  ;;  %v277_v36 = vand.u32 2147483647, %v269_v31 }
  0x65   : > { %v281_v33 = vadd.f32 %v280_v30, %v273_v24 }
  0x67   : > { %v282_v35 = vadd.f32 %v281_v33, %v274_v29 }
  0x69   : > { %v283_v37 = vadd.f32 %v282_v35, %v275_v32 }
  0x6b   : > { %v284_v38 = vadd.f32 %v283_v37, %v276_v34  ;;  %291 = sbr.rel (%p409_p13) target bundleno = 326 (0x146), region = 44 }
  0x6d   : > { %v285_v40 = vadd.f32 %v284_v38, %v277_v36 }
  0x6f   : > { %v286_v41 = vadd.f32 %v285_v40, %v278_v39 }
  0x71   : > { %287 = vst [vmem:[#allocation2] sm:$0xff] %v286_v41 }
  0x78   : > { %v292_v42 = vld [vmem:[#allocation2] sm:$0xff] }
  0x79   : > { %293 = vadd.xlane.f32.xlu0 %v292_v42 }
 0x106   : > { %v294_v43 = vpop.xlane.xlu0 %293 }
 0x107   : > { %v295_v44 = vrot.slane %v294_v43, 4 }
 0x109   : > { %v296_v45 = vadd.f32 %v295_v44, %v294_v43 }
 0x10b   : > { %v297_v46 = vrot.slane %v296_v45, 2 }
 0x10d   : > { %v298_v47 = vadd.f32 %v297_v46, %v296_v45 }
 0x10f   : > { %v299_v48 = vrot.slane %v298_v47, 1 }
 0x111   : > { %v300_v49 = vadd.f32 %v299_v48, %v298_v47 }
 0x113   : > { %416 = vpush %v300_v49 }
 0x144   : > { %s417_s20 = spop %416 }
 0x145   : > { %303 = sst [smem:[#allocation8]] %s417_s20 }
 0x146 PF: > { %p434_p6 = scmp.eq.s32.totalorder %s396_s15, 3  ;;  %s548_s12 = scalar_lea.hbm %s859_s2, 16 }
 0x147   : > { %p549_p10 = scmp.ne.s32.totalorder %s859_s2, %s548_s12  ;;  %p554_p1 = scmp.lt.u32.totalorder %s548_s12, %s859_s2 }
 0x149   : > { %p550_p3 = pnand %p549_p10, %p434_p6 }
 0x14b   : > { %p551_p4 = pneg %p550_p3 }
 0x14d   : > { %p556_p5 = pnand %p554_p1, %p551_p4 }
 0x14f   : > { %559 = shalt.err (!%p556_p5)
}
 0x150   : > { %s625_s23 = smov [#allocation8]  }
 0x151   : > { %423 = dma.smem_to_hbm (%p434_p6), %s625_s23, 16, %s859_s2, [#allocation5]  }
 0x152   : > { %593 = dma.done.wait (%p434_p6), [#allocation5], 16  }
 0x153   : > { %595 = vsyncadd (%p434_p6), [#allocation5], 4294967280 }
 0x154   : > { %319 = sfence }
 0x155 PF: > { %s19_s14 = sadd.s32 1, %s618_s14   ;;  %s865_s9 = smov %s602_s10 }
 0x156   : > { %p16_p7 = scmp.ge.s32.totalorder %s19_s14, 6   ;;  %s866_s10 = smov %s606_s11 }
 0x157   : > { %s867_s11 = smov %s697_s24  ;;  %s868_s12 = smov %s614_s13 }
 0x158   : > { %s869_s13 = smov %s871_s16  ;;  %18 = sbr.rel (!%p16_p7) target bundleno = 7 (0x7), region = 88 }
 0x15f   :  { %325 = vsyncpa [#allocation4], 1 }
 0x160   :  { %327 = vsyncpa [#allocation4 + $0x1], 1 }
 0x161   :  { %328 = vsyncpa [#allocation7], 1 }
 0x162   :  { %330 = vsyncpa [#allocation7 + $0x1], 1 }
 0x163   :  { %331 = vsyncpa [#allocation5], 1 }
 0x164   :  { %333 = vsyncpa [#allocation5 + $0x1], 1 }

</bundles_post_ra>
